<compile_context>
chip_gen: v5e
topology: v5e:2x2
jax: 0.10.0
libtpu: 0.0.40
codegen_flags: <defaults>
</compile_context>

<pallas_src>
import math
from functools import lru_cache

import jax
import jax.numpy as jnp
from jax.experimental import pallas as pl
from jax.experimental.pallas import tpu as pltpu


# --------------------------------------------------------------------------- #
# Hardware probes (best-effort, safe fallbacks)
# --------------------------------------------------------------------------- #
@lru_cache(maxsize=None)
def _vmem_capacity_bytes() -> int:
    try:
        return int(pltpu.get_tpu_info().vmem_capacity_bytes)
    except Exception:
        return 128 * 1024 * 1024  # v5e/v6e-class default


@lru_cache(maxsize=None)
def _grid_semantics() -> tuple:
    """CORE_PARALLEL only on v7x (2 TCs/chip); plain PARALLEL elsewhere."""
    try:
        kind = jax.devices()[0].device_kind.lower()
        if "v7" in kind or "7x" in kind:
            return (pltpu.CORE_PARALLEL,)
    except Exception:
        pass
    return (pltpu.PARALLEL,)


def _sublane_multiple(dtype) -> int:
    # 8 for 4-byte, 16 for 2-byte, 32 for 1-byte dtypes.
    return max(8, 32 // jnp.dtype(dtype).itemsize)


# --------------------------------------------------------------------------- #
# Kernel
# --------------------------------------------------------------------------- #
def _pe_add_kernel(x_ref, pe_ref, o_ref):
    # x_ref / o_ref: (ts*B, D) flattened (seq, batch) rows; pe_ref: (ts, D).
    ts, d = pe_ref.shape
    rows = x_ref.shape[0]
    b = rows // ts
    pe = pe_ref[...]
    if b == 1:
        o_ref[...] = x_ref[...] + pe
    else:
        # Expand pe per sequence position to all batch rows (small relayout,
        # hidden under the HBM-bound DMA).
        pe_rows = jnp.broadcast_to(pe[:, None, :], (ts, b, d)).reshape(rows, d)
        o_ref[...] = x_ref[...] + pe_rows


# --------------------------------------------------------------------------- #
# "Module init": build the sin/cos table once, already in the model dtype.
# --------------------------------------------------------------------------- #
def make_positional_encoding(d_model: int, max_len: int = 5000,
                             dtype=jnp.float32) -> jnp.ndarray:
    """Deterministic buffer identical to the PyTorch __init__, shape (max_len, d_model)."""
    assert d_model % 2 == 0, "d_model must be even (as in the reference module)"
    position = jnp.arange(0, max_len, dtype=jnp.float32)[:, None]            # (max_len, 1)
    div_term = jnp.exp(
        jnp.arange(0, d_model, 2, dtype=jnp.float32) * (-math.log(10000.0) / d_model)
    )                                                                         # (d_model//2,)
    angles = position * div_term                                              # (max_len, d_model//2)
    # interleave: even cols = sin, odd cols = cos (matches pe[:,0::2]/pe[:,1::2])
    pe = jnp.stack([jnp.sin(angles), jnp.cos(angles)], axis=-1).reshape(max_len, d_model)
    return pe.astype(dtype)


# --------------------------------------------------------------------------- #
# Forward
# --------------------------------------------------------------------------- #
def positional_encoding_forward(
    x: jnp.ndarray, pe: jnp.ndarray, *, block_rows: int | None = None
) -> jnp.ndarray:
    """x: (S, B, D);  pe: (max_len, D), same dtype as x.  Returns x + pe[:S]."""
    S, B, D = x.shape
    assert pe.ndim == 2 and pe.shape[1] == D, "pe must be a (max_len, d_model) table"
    assert pe.shape[0] >= S, "sequence longer than positional-encoding table"
    assert pe.dtype == x.dtype, "precompute pe in the model dtype (no per-call cast)"
    # Note: D < 128 still runs correctly (full-extent lane dim) but lowers to
    # partially-masked stores; typical d_model >= 128 is fully lane-dense.

    itemsize = jnp.dtype(x.dtype).itemsize
    sub = _sublane_multiple(x.dtype)
    row_bytes = B * D * itemsize

    # Generation-aware block target: ~4 MiB per x/out block on 64-MiB-VMEM
    # parts (v7x), ~8 MiB on 128-MiB-VMEM parts (v5e/v6e).
    vmem_cap = _vmem_capacity_bytes()
    target_block_bytes = (4 << 20) if vmem_cap <= (64 << 20) else (8 << 20)

    if block_rows is not None:
        ts = block_rows
    else:
        ts = max(1, target_block_bytes // row_bytes)
    ts = min(ts, S)
    # Round UP to the dtype's sublane multiple so both the (ts*B, D) x block
    # and the (ts, D) pe block satisfy the tiling rule; Pallas masks the
    # partial last block.
    ts = ((ts + sub - 1) // sub) * sub
    grid = (pl.cdiv(S, ts),)

    # Flatten x to lane+sublane-dense rows (metadata-only, row-major layout
    # of a contiguous (S, B, D) array is unchanged).
    x2 = x.reshape(S * B, D)

    x_block_bytes = ts * B * D * itemsize
    pe_block_bytes = ts * D * itemsize
    # Double-buffered input, output and pe blocks, plus headroom.
    vmem_limit = max(16 << 20, 2 * (2 * x_block_bytes + pe_block_bytes) + (2 << 20))

    cost = pl.CostEstimate(
        flops=S * B * D,
        transcendentals=0,
        bytes_accessed=(2 * S * B * D + S * D) * itemsize,
    )

    out2 = pl.pallas_call(
        _pe_add_kernel,
        out_shape=jax.ShapeDtypeStruct((S * B, D), x.dtype),
        grid=grid,
        in_specs=[
            pl.BlockSpec((ts * B, D), lambda i: (i, 0)),   # x rows
            pl.BlockSpec((ts, D), lambda i: (i, 0)),       # pe rows (full table fed)
        ],
        out_specs=pl.BlockSpec((ts * B, D), lambda i: (i, 0)),
        compiler_params=pltpu.CompilerParams(
            dimension_semantics=_grid_semantics(),
            vmem_limit_bytes=int(vmem_limit),
        ),
        cost_estimate=cost,
    )(x2, pe)
    return out2.reshape(S, B, D)


# --------------------------------------------------------------------------- #
# Tests
# --------------------------------------------------------------------------- #
if __name__ == "__main__":
    # --- test 1: small shape matching the module's toy usage (f32) -----------
    d_model, seq_len, batch = 32, 8, 2
    key = jax.random.PRNGKey(0)
    x = jax.random.normal(key, (seq_len, batch, d_model), dtype=jnp.float32)
    pe = make_positional_encoding(d_model, max_len=64)

    out = jax.block_until_ready(positional_encoding_forward(x, pe))
    ref = x + pe[:seq_len][:, None, :]
    assert out.shape == (seq_len, batch, d_model)
    assert jnp.allclose(out, ref, atol=1e-6), "mismatch vs reference (test 1)"

    # --- test 2: multi-block f32 grid with (8,128)-aligned tiles -------------
    d2, s2, b2 = 128, 48, 8
    x2 = jax.random.normal(jax.random.PRNGKey(0), (s2, b2, d2), dtype=jnp.float32)
    pe2 = make_positional_encoding(d2, max_len=64)

    out2 = jax.block_until_ready(positional_encoding_forward(x2, pe2, block_rows=16))
    ref2 = x2 + pe2[:s2][:, None, :]
    assert out2.shape == (s2, b2, d2)
    assert jnp.allclose(out2, ref2, atol=1e-6), "mismatch vs reference (test 2)"

    # --- test 3: bf16 small-batch path (flattened rows, 16-row alignment) ----
    d3, s3, b3 = 128, 64, 2
    x3 = jax.random.normal(jax.random.PRNGKey(0), (s3, b3, d3),
                           dtype=jnp.float32).astype(jnp.bfloat16)
    pe3 = make_positional_encoding(d3, max_len=128, dtype=jnp.bfloat16)

    out3 = jax.block_until_ready(positional_encoding_forward(x3, pe3, block_rows=32))
    ref3 = x3 + pe3[:s3][:, None, :]
    assert out3.shape == (s3, b3, d3)
    assert jnp.allclose(out3.astype(jnp.float32), ref3.astype(jnp.float32),
                        atol=5e-2), "mismatch vs reference (test 3)"

    print("KERNEL_OK")
</pallas_src>

<mosaic_0001>
module attributes {stable_mosaic.version = 11 : i64} {
  func.func @_pe_add_kernel(%arg0: i32, %arg1: memref<16x32xf32, #tpu.memory_space<vmem>>, %arg2: memref<8x32xf32, #tpu.memory_space<vmem>>, %arg3: memref<16x32xf32, #tpu.memory_space<vmem>>) attributes {dimension_semantics = [#tpu.dimension_semantics<parallel>], iteration_bounds = array<i64: 1>, scalar_prefetch = 0 : i64, scratch_operands = 0 : i64, tpu.core_type = #tpu.core_type<tc>, window_params = [{transform_indices = @transform_0, window_bounds = array<i64: 16, 32>}, {transform_indices = @transform_1, window_bounds = array<i64: 8, 32>}, {transform_indices = @transform_2, window_bounds = array<i64: 16, 32>}]} {
    %c0 = arith.constant 0 : index
    %c0_0 = arith.constant 0 : index
    %0 = vector.load %arg2[%c0, %c0_0] : memref<8x32xf32, #tpu.memory_space<vmem>>, vector<8x32xf32>
    %1 = vector.shape_cast %0 : vector<8x32xf32> to vector<8x1x32xf32>
    %2 = vector.shape_cast %1 : vector<8x1x32xf32> to vector<8x1x32xf32>
    %3 = vector.broadcast %2 : vector<8x1x32xf32> to vector<8x2x32xf32>
    %4 = vector.shape_cast %3 : vector<8x2x32xf32> to vector<16x32xf32>
    %c0_1 = arith.constant 0 : index
    %c0_2 = arith.constant 0 : index
    %5 = vector.load %arg1[%c0_1, %c0_2] : memref<16x32xf32, #tpu.memory_space<vmem>>, vector<16x32xf32>
    %6 = arith.addf %5, %4 : vector<16x32xf32>
    %c0_3 = arith.constant 0 : index
    %c0_4 = arith.constant 0 : index
    %7 = vector.load %arg3[%c0_3, %c0_4] : memref<16x32xf32, #tpu.memory_space<vmem>>, vector<16x32xf32>
    tpu.vector_store %arg3[%c0_3, %c0_4], %6 {strides = array<i32>} : memref<16x32xf32, #tpu.memory_space<vmem>>, vector<16x32xf32>,
    return
  }
  func.func @transform_0(%arg0: i32) -> (i32, i32) {
    %c0_i32 = arith.constant 0 : i32
    %c0_i32_0 = arith.constant 0 : i32
    return %arg0, %c0_i32 : i32, i32
  }
  func.func @transform_1(%arg0: i32) -> (i32, i32) {
    %c0_i32 = arith.constant 0 : i32
    %c0_i32_0 = arith.constant 0 : i32
    return %arg0, %c0_i32 : i32, i32
  }
  func.func @transform_2(%arg0: i32) -> (i32, i32) {
    %c0_i32 = arith.constant 0 : i32
    %c0_i32_0 = arith.constant 0 : i32
    return %arg0, %c0_i32 : i32, i32
  }
}

</mosaic_0001>

<bundles_post_ra>
// kernel: tpu_custom_call.1
= control target key start
LH: loop header
LB: loop body
LE: loop exit
PB: predicated region body
PF: predicated region fallthrough
CT: control target
= control target key end

     0   :  { %s132_s0 = inlined_call_operand.vmem [shape: f32[16,32], index: 0, kind: input, shape index: {}]   ;;  %s133_s1 = inlined_call_operand.vmem [shape: f32[64,32], index: 1, kind: input, shape index: {}]   ;;  %s134_s2 = inlined_call_operand.hbm [shape: f32[16,32], index: 2, kind: output, shape index: {}]  }
   0x1   :  { %v12_v0 = vld [vmem:[%s133_s1] sm:$0xff] }
   0x2   :  { %v21_v1 = vperm.slane %v12_v0, 0  ;;  %v14_v2 = vrot.slane %v12_v0, 1  ;;  %v15_v3 = vrot.slane %v12_v0, 2  ;;  %v16_v4 = vrot.slane %v12_v0, 3 }
   0x3   :  { %7 = vsyncpa [#allocation3], 0  ;;  %v17_v5 = vrot.slane %v12_v0, 4  ;;  %v18_v6 = vrot.slane %v12_v0, 5  ;;  %v19_v7 = vrot.slane %v12_v0, 6  ;;  %v20_v11 = vrot.slane %v12_v0, 7 }
   0x4   :  { %31 = vst [vmem:[#allocation1] ss:$4 sm:$0xff] %v21_v1  ;;  %v22_v8 = vperm.slane %v14_v2, 0  ;;  %v23_v9 = vperm.slane %v15_v3, 0  ;;  %v24_v10 = vperm.slane %v16_v4, 0  ;;  %v29_v16 = vld [vmem:[%s132_s0] sm:$0xff] }
   0x5   :  { %v25_v12 = vperm.slane %v17_v5, 0  ;;  %v26_v13 = vperm.slane %v18_v6, 0  ;;  %v27_v14 = vperm.slane %v19_v7, 0  ;;  %v28_v15 = vperm.slane %v20_v11, 0  ;;  %s61_s14 = sshll.u32 %s134_s2, 4  ;;  %v30_v19 = vld [vmem:[%s132_s0 + $0x8] sm:$0xff]  ;;  %s62_s14 = int_to_ptr.hbm [resolvable:$true] %s61_s14 }
   0x6   :  { %33 = vst [vmem:[#allocation1 + $0x1] ss:$4 sm:$0xff] %v22_v8  ;;  %vm52_vm0 = vcmask 261120   ;;  %s102_s17 = smov [#allocation2]   ;;  %s103_s19 = smov 128  }
   0x7   :  { %35 = vst [vmem:[#allocation1 + $0x2] ss:$4 sm:$0xff] %v23_v9  ;;  %s59_s18 = sshll.u32 %s102_s17, 4  ;;  %s104_s20 = smov 8   ;;  %s60_s18 = int_to_ptr.vmem [resolvable:$true] %s59_s18 }
   0x8   :  { %37 = vst [vmem:[#allocation1 + $0x3] ss:$4 sm:$0xff] %v24_v10 }
   0x9   :  { %39 = vst [vmem:[#allocation1 + $0x20] ss:$4 sm:$0xff] %v25_v12 }
   0xa   :  { %41 = vst [vmem:[#allocation1 + $0x21] ss:$4 sm:$0xff] %v26_v13 }
   0xb   :  { %43 = vst [vmem:[#allocation1 + $0x22] ss:$4 sm:$0xff] %v27_v14 }
   0xc   :  { %45 = vst [vmem:[#allocation1 + $0x23] ss:$4 sm:$0xff] %v28_v15 }
   0xf   :  { %v46_v17 = vld.sshfl [vmem:[#allocation1] sm:$0xff pattern:$0x73625140] }
  0x10   :  { %v50_v18 = vadd.f32 %v46_v17, %v29_v16 }
  0x12   :  { %53 = vst.msk [vmem:[#allocation2] sm:$0xff] %vm52_vm0, %v50_v18 }
  0x13   :  { %v47_v20 = vld.sshfl [vmem:[#allocation1 + $0x20] sm:$0xff pattern:$0x73625140] }
  0x14   :  { %v51_v21 = vadd.f32 %v47_v20, %v30_v19 }
  0x16   :  { %54 = vst.msk [vmem:[#allocation2 + $0x8] sm:$0xff] %vm52_vm0, %v51_v21 }
  0x17   :  { %67 = dma.vmem_to_hbm [thread:$0]  %s60_s18, 256, %s62_s14, [#allocation3], %s103_s19, %s103_s19, %s104_s20  }
  0x18   :  { %100 = dma.done.wait [#allocation3], 256  }
  0x19   :  { %101 = vsyncadd [#allocation3], 4294967040 }
  0x1a   :  { %72 = vsyncpa [#allocation3], 1 }

</bundles_post_ra>
